<compile_context>
chip_gen: v7x
topology: tpu7x:2x2x1
jax: 0.10.0
libtpu: 0.0.40
codegen_flags: <defaults>
</compile_context>

<pallas_src>
import jax
import jax.numpy as jnp
from jax.experimental import pallas as pl
from jax.experimental.pallas import tpu as pltpu


def _generator_kernel(x_ref, w0_ref, b0_ref, w1_ref, b1_ref, w2_ref, b2_ref, o_ref):
    # x_ref block: (1, L, TD); weights fully resident in VMEM.
    x = x_ref[0]                                   # (L, TD)

    # input_layer: Linear(L, L) + ReLU   (computed in transposed domain: W0 @ x)
    h0 = jnp.dot(w0_ref[...], x, preferred_element_type=jnp.float32) + b0_ref[...]
    h0 = jnp.maximum(h0, 0.0)                      # (L, TD)

    # layers[0]: Linear(L, F) ; layers[1]: ReLU
    h1 = jnp.dot(w1_ref[...], h0, preferred_element_type=jnp.float32) + b1_ref[...]
    h1 = jnp.maximum(h1, 0.0)                      # (F, TD)

    # layers[2]: Linear(F, L)
    y = jnp.dot(w2_ref[...], h1, preferred_element_type=jnp.float32) + b2_ref[...]

    o_ref[0] = y.astype(o_ref.dtype)               # (L, TD) -> final layout, no transpose


def _pick_d_tile(D):
    # Lane-dense tile when possible; otherwise the full dim (required by the
    # (8, 128) BlockSpec rule for non-full blocks).
    if D % 128 == 0:
        for cand in (512, 256, 128):
            if D % cand == 0:
                return cand
    return D


def generator_forward(x, m, params):
    """x, m: (B, L, D) float32. Returns (B, L, D) float32."""
    del m  # unused in the use_irm=False branch (see TODO above)
    B, L, D = x.shape
    w0, b0, w1, b1, w2, b2 = params
    F = w1.shape[0]

    td = _pick_d_tile(D)
    grid = (B, D // td)

    def full(shape):
        return pl.BlockSpec(shape, lambda b, j: (0,) * len(shape))

    out = pl.pallas_call(
        _generator_kernel,
        out_shape=jax.ShapeDtypeStruct((B, L, D), jnp.float32),
        grid_spec=pltpu.PrefetchScalarGridSpec(
            num_scalar_prefetch=0,
            grid=grid,
            in_specs=[
                pl.BlockSpec((1, L, td), lambda b, j: (b, 0, j)),  # x (natural layout)
                full((L, L)),                                      # w0
                full((L, 1)),                                      # b0 (column)
                full((F, L)),                                      # w1
                full((F, 1)),                                      # b1
                full((L, F)),                                      # w2
                full((L, 1)),                                      # b2
            ],
            out_specs=pl.BlockSpec((1, L, td), lambda b, j: (b, 0, j)),
        ),
        compiler_params=pltpu.CompilerParams(
            dimension_semantics=("parallel", "parallel"),
        ),
    )(x, w0, b0, w1, b1, w2, b2)

    return out


def init_params(key, l_seq, n_feature):
    """Deterministic PyTorch-style (uniform +/- 1/sqrt(fan_in)) initialization.

    Biases are stored as (out_features, 1) columns so the kernel can add them
    with a pure lane-broadcast (no in-kernel reshape).
    """
    ks = jax.random.split(key, 6)

    def lin(kw, kb, out_f, in_f):
        bound = 1.0 / jnp.sqrt(in_f)
        w = jax.random.uniform(kw, (out_f, in_f), jnp.float32, -bound, bound)
        b = jax.random.uniform(kb, (out_f, 1), jnp.float32, -bound, bound)
        return w, b

    w0, b0 = lin(ks[0], ks[1], l_seq, l_seq)        # input_layer: Linear(L, L)
    w1, b1 = lin(ks[2], ks[3], n_feature, l_seq)    # layers[0]:   Linear(L, F)
    w2, b2 = lin(ks[4], ks[5], l_seq, n_feature)    # layers[2]:   Linear(F, L)
    return (w0, b0, w1, b1, w2, b2)


def reference_forward(x, m, params):
    """Pure-JAX reference following the torch forward literally (with transposes)."""
    del m
    w0, b0, w1, b1, w2, b2 = params
    xt = jnp.transpose(x, (0, 2, 1))                                     # (B, D, L)
    h0 = jnp.maximum(jnp.einsum("bdl,kl->bdk", xt, w0) + b0[:, 0], 0.0)  # (B, D, L)
    h1 = jnp.maximum(jnp.einsum("bdl,fl->bdf", h0, w1) + b1[:, 0], 0.0)  # (B, D, F)
    y = jnp.einsum("bdf,lf->bdl", h1, w2) + b2[:, 0]                     # (B, D, L)
    return jnp.transpose(y, (0, 2, 1))                                   # (B, L, D)


if __name__ == "__main__":
    B, L, D, F = 2, 8, 4, 32  # batch, l_seq, data features, n_feature (hidden)

    key = jax.random.PRNGKey(0)
    kx, km, kp = jax.random.split(key, 3)
    x = jax.random.normal(kx, (B, L, D), jnp.float32)
    m = (jax.random.uniform(km, (B, L, D)) > 0.5).astype(jnp.float32)

    params = init_params(kp, L, F)

    out = generator_forward(x, m, params)
    out = jax.block_until_ready(out)

    ref = reference_forward(x, m, params)
    assert out.shape == (B, L, D)
    assert jnp.allclose(out, ref, atol=1e-5, rtol=1e-5), "mismatch vs reference"

    print("KERNEL_OK")
</pallas_src>

<mosaic_0001>
module attributes {stable_mosaic.version = 11 : i64} {
  func.func @_generator_kernel(%arg0: i32, %arg1: i32, %arg2: memref<1x8x4xf32, #tpu.memory_space<vmem>>, %arg3: memref<8x8xf32, #tpu.memory_space<vmem>>, %arg4: memref<8x1xf32, #tpu.memory_space<vmem>>, %arg5: memref<32x8xf32, #tpu.memory_space<vmem>>, %arg6: memref<32x1xf32, #tpu.memory_space<vmem>>, %arg7: memref<8x32xf32, #tpu.memory_space<vmem>>, %arg8: memref<8x1xf32, #tpu.memory_space<vmem>>, %arg9: memref<1x8x4xf32, #tpu.memory_space<vmem>>) attributes {dimension_semantics = [#tpu.dimension_semantics<parallel>, #tpu.dimension_semantics<parallel>], iteration_bounds = array<i64: 2, 1>, scalar_prefetch = 0 : i64, scratch_operands = 0 : i64, tpu.core_type = #tpu.core_type<tc>, window_params = [{transform_indices = @transform_0, window_bounds = array<i64: 1, 8, 4>}, {pipeline_mode = #tpu.pipeline_mode<synchronous>, transform_indices = @transform_1, window_bounds = array<i64: 8, 8>}, {pipeline_mode = #tpu.pipeline_mode<synchronous>, transform_indices = @transform_2, window_bounds = array<i64: 8, 1>}, {pipeline_mode = #tpu.pipeline_mode<synchronous>, transform_indices = @transform_3, window_bounds = array<i64: 32, 8>}, {pipeline_mode = #tpu.pipeline_mode<synchronous>, transform_indices = @transform_4, window_bounds = array<i64: 32, 1>}, {pipeline_mode = #tpu.pipeline_mode<synchronous>, transform_indices = @transform_5, window_bounds = array<i64: 8, 32>}, {pipeline_mode = #tpu.pipeline_mode<synchronous>, transform_indices = @transform_6, window_bounds = array<i64: 8, 1>}, {transform_indices = @transform_7, window_bounds = array<i64: 1, 8, 4>}]} {
    %c0 = arith.constant 0 : index
    %c0_0 = arith.constant 0 : index
    %c0_1 = arith.constant 0 : index
    %0 = vector.load %arg2[%c0, %c0_0, %c0_1] : memref<1x8x4xf32, #tpu.memory_space<vmem>>, vector<1x8x4xf32>
    %1 = vector.shape_cast %0 : vector<1x8x4xf32> to vector<8x4xf32>
    %c0_2 = arith.constant 0 : index
    %c0_3 = arith.constant 0 : index
    %2 = vector.load %arg3[%c0_2, %c0_3] : memref<8x8xf32, #tpu.memory_space<vmem>>, vector<8x8xf32>
    %cst = arith.constant dense<0.000000e+00> : vector<8x4xf32>
    %3 = tpu.matmul %2, %1, %cst {dimension_numbers = #tpu.dot_dimension_numbers<[1], [0], [0], [1], [0, 0, 1, 1], [], []>} : vector<8x8xf32>, vector<8x4xf32>, vector<8x4xf32> -> vector<8x4xf32>
    %c0_4 = arith.constant 0 : index
    %c0_5 = arith.constant 0 : index
    %4 = vector.load %arg4[%c0_4, %c0_5] : memref<8x1xf32, #tpu.memory_space<vmem>>, vector<8x1xf32>
    %5 = vector.broadcast %4 : vector<8x1xf32> to vector<8x4xf32>
    %6 = arith.addf %3, %5 : vector<8x4xf32>
    %cst_6 = arith.constant 0.000000e+00 : f32
    %7 = vector.broadcast %cst_6 : f32 to vector<8x4xf32>
    %8 = arith.maximumf %6, %7 : vector<8x4xf32>
    %c0_7 = arith.constant 0 : index
    %c0_8 = arith.constant 0 : index
    %9 = vector.load %arg5[%c0_7, %c0_8] : memref<32x8xf32, #tpu.memory_space<vmem>>, vector<32x8xf32>
    %cst_9 = arith.constant dense<0.000000e+00> : vector<32x4xf32>
    %10 = tpu.matmul %9, %8, %cst_9 {dimension_numbers = #tpu.dot_dimension_numbers<[1], [0], [0], [1], [0, 0, 1, 1], [], []>} : vector<32x8xf32>, vector<8x4xf32>, vector<32x4xf32> -> vector<32x4xf32>
    %c0_10 = arith.constant 0 : index
    %c0_11 = arith.constant 0 : index
    %11 = vector.load %arg6[%c0_10, %c0_11] : memref<32x1xf32, #tpu.memory_space<vmem>>, vector<32x1xf32>
    %12 = vector.broadcast %11 : vector<32x1xf32> to vector<32x4xf32>
    %13 = arith.addf %10, %12 : vector<32x4xf32>
    %cst_12 = arith.constant 0.000000e+00 : f32
    %14 = vector.broadcast %cst_12 : f32 to vector<32x4xf32>
    %15 = arith.maximumf %13, %14 : vector<32x4xf32>
    %c0_13 = arith.constant 0 : index
    %c0_14 = arith.constant 0 : index
    %16 = vector.load %arg7[%c0_13, %c0_14] : memref<8x32xf32, #tpu.memory_space<vmem>>, vector<8x32xf32>
    %cst_15 = arith.constant dense<0.000000e+00> : vector<8x4xf32>
    %17 = tpu.matmul %16, %15, %cst_15 {dimension_numbers = #tpu.dot_dimension_numbers<[1], [0], [0], [1], [0, 0, 1, 1], [], []>} : vector<8x32xf32>, vector<32x4xf32>, vector<8x4xf32> -> vector<8x4xf32>
    %c0_16 = arith.constant 0 : index
    %c0_17 = arith.constant 0 : index
    %18 = vector.load %arg8[%c0_16, %c0_17] : memref<8x1xf32, #tpu.memory_space<vmem>>, vector<8x1xf32>
    %19 = vector.broadcast %18 : vector<8x1xf32> to vector<8x4xf32>
    %20 = arith.addf %17, %19 : vector<8x4xf32>
    %c0_18 = arith.constant 0 : index
    %c0_19 = arith.constant 0 : index
    %c0_20 = arith.constant 0 : index
    %21 = vector.load %arg9[%c0_18, %c0_19, %c0_20] : memref<1x8x4xf32, #tpu.memory_space<vmem>>, vector<1x8x4xf32>
    %22 = vector.shape_cast %21 : vector<1x8x4xf32> to vector<8x4xf32>
    %23 = vector.shape_cast %20 : vector<8x4xf32> to vector<1x8x4xf32>
    tpu.vector_store %arg9[%c0_18, %c0_19, %c0_20], %23 {strides = array<i32>} : memref<1x8x4xf32, #tpu.memory_space<vmem>>, vector<1x8x4xf32>,
    return
  }
  func.func @transform_0(%arg0: i32, %arg1: i32) -> (i32, i32, i32) {
    %c0_i32 = arith.constant 0 : i32
    %c0_i32_0 = arith.constant 0 : i32
    return %arg0, %c0_i32, %arg1 : i32, i32, i32
  }
  func.func @transform_1(%arg0: i32, %arg1: i32) -> (i32, i32) {
    %c0_i32 = arith.constant 0 : i32
    %c0_i32_0 = arith.constant 0 : i32
    %c0_i32_1 = arith.constant 0 : i32
    return %c0_i32, %c0_i32_0 : i32, i32
  }
  func.func @transform_2(%arg0: i32, %arg1: i32) -> (i32, i32) {
    %c0_i32 = arith.constant 0 : i32
    %c0_i32_0 = arith.constant 0 : i32
    %c0_i32_1 = arith.constant 0 : i32
    return %c0_i32, %c0_i32_0 : i32, i32
  }
  func.func @transform_3(%arg0: i32, %arg1: i32) -> (i32, i32) {
    %c0_i32 = arith.constant 0 : i32
    %c0_i32_0 = arith.constant 0 : i32
    %c0_i32_1 = arith.constant 0 : i32
    return %c0_i32, %c0_i32_0 : i32, i32
  }
  func.func @transform_4(%arg0: i32, %arg1: i32) -> (i32, i32) {
    %c0_i32 = arith.constant 0 : i32
    %c0_i32_0 = arith.constant 0 : i32
    %c0_i32_1 = arith.constant 0 : i32
    return %c0_i32, %c0_i32_0 : i32, i32
  }
  func.func @transform_5(%arg0: i32, %arg1: i32) -> (i32, i32) {
    %c0_i32 = arith.constant 0 : i32
    %c0_i32_0 = arith.constant 0 : i32
    %c0_i32_1 = arith.constant 0 : i32
    return %c0_i32, %c0_i32_0 : i32, i32
  }
  func.func @transform_6(%arg0: i32, %arg1: i32) -> (i32, i32) {
    %c0_i32 = arith.constant 0 : i32
    %c0_i32_0 = arith.constant 0 : i32
    %c0_i32_1 = arith.constant 0 : i32
    return %c0_i32, %c0_i32_0 : i32, i32
  }
  func.func @transform_7(%arg0: i32, %arg1: i32) -> (i32, i32, i32) {
    %c0_i32 = arith.constant 0 : i32
    %c0_i32_0 = arith.constant 0 : i32
    return %arg0, %c0_i32, %arg1 : i32, i32, i32
  }
}

</mosaic_0001>

<bundles_post_ra>
// kernel: tpu_custom_call.1
= control target key start
LH: loop header
LB: loop body
LE: loop exit
PB: predicated region body
PF: predicated region fallthrough
CT: control target
= control target key end

     0   :  { %s829_s24 = smov 0   ;;  %s831_s25 = smov 0   ;;  %s912_s0 = inlined_call_operand.vmem [shape: f32[2,8,4], index: 0, kind: input, shape index: {}]   ;;  %s913_s1 = inlined_call_operand.vmem [shape: f32[8,8], index: 1, kind: input, shape index: {}]   ;;  %s914_s2 = inlined_call_operand.vmem [shape: f32[8,1], index: 2, kind: input, shape index: {}]   ;;  %s915_s3 = inlined_call_operand.vmem [shape: f32[32,8], index: 3, kind: input, shape index: {}]   ;;  %s916_s4 = inlined_call_operand.vmem [shape: f32[32,1], index: 4, kind: input, shape index: {}]   ;;  %s917_s5 = inlined_call_operand.vmem [shape: f32[8,32], index: 5, kind: input, shape index: {}]   ;;  %s918_s6 = inlined_call_operand.vmem [shape: f32[8,1], index: 6, kind: input, shape index: {}]   ;;  %s919_s7 = inlined_call_operand.vmem [shape: f32[2,8,4], index: 7, kind: output, shape index: {}]  }
   0x1   :  { %s833_s26 = smov 0  }
   0x2 LB: > { %s29_s27 = sadd.s32 1, %s779_s25  ;;  %p678_p0 = scmp.ge.s32.totalorder %s783_s26, 1  ;;  %s783_s26 = sphi %s833_s26, %s17_s26   ;;  %s779_s25 = sphi %s831_s25, %s921_s25   ;;  %s775_s24 = sphi %s829_s24, %s920_s24  }
   0x3   : > { %p31_p1 = scmp.ge.s32.totalorder %s29_s27, 2  ;;  %p255_p2 = scmp.lt.s32.totalorder %s783_s26, 3 }
   0x5   : > { %s923_s27 = smov (%p31_p1, %s29_s27), 0  ;;  %p256_p3 = pnand %p678_p0, %p255_p2 }
   0x6   : > { %p291_p4 = scmp.lt.s32.totalorder (!%p256_p3), %s775_s24, 1  ;;  %v785_v0 = vmov (!%p256_p3), 0.0   ;;  %vm786_vm0 = vmmov (!%p256_p3), 0   ;;  %v307_v1 = vld [vmem:[%s914_s2] sm:$0xff] (!%p256_p3)  ;;  %v787_v2 = vmov (!%p256_p3), 0   ;;  %vm313_vm1 = vcmask (!%p256_p3), 64512  }
   0x7   : > { %259 = sbr.rel (%p256_p3) target bundleno = 678 (0x2a6), region = 48  ;;  %701 = vmatprep.subr.mxu0 (!%p256_p3), %v785_v0  ;;  %703 = vmatprep.mubr.msk.f32.mxu0 (!%p256_p3), %vm786_vm0, %v785_v0  ;;  %v392_v3 = vld [vmem:[%s916_s4] sm:$0xff] (!%p256_p3)  ;;  %v395_v6 = vld [vmem:[%s916_s4 + $0x18] sm:$0xff] (!%p256_p3)  ;;  %v393_v8 = vld [vmem:[%s916_s4 + $0x8] sm:$0xff] (!%p256_p3)  ;;  %v788_v19 = vmov (!%p256_p3), 0.0|0.0   ;;  %vm524_vm2 = vcmask (!%p256_p3), 261120  }
   0x8   : > { %759 = vset.pattern.permute.xlu0 (!%p256_p3), %v787_v2  ;;  %760 = vset.pattern.permute.xlu1 (!%p256_p3), %v787_v2  ;;  %v306_v4 = vld [vmem:[%s913_s1] sm:$0xff] (!%p256_p3)  ;;  %v394_v9 = vld [vmem:[%s916_s4 + $0x10] sm:$0xff] (!%p256_p3)  ;;  %v389_v16 = vld [vmem:[%s915_s3 + $0x8] sm:$0xff] (!%p256_p3)  ;;  %vm598_vm3 = vcmask (!%p256_p3), 31744  }
   0x9   : > { %310 = vperm.xlu0 (!%p256_p3), %759, %v307_v1   ;;  %v388_v7 = vld [vmem:[%s915_s3] sm:$0xff] (!%p256_p3)  ;;  %403 = vperm.xlu1 (!%p256_p3), %760, %v393_v8   ;;  %v390_v17 = vld [vmem:[%s915_s3 + $0x10] sm:$0xff] (!%p256_p3)  ;;  %v391_v18 = vld [vmem:[%s915_s3 + $0x18] sm:$0xff] (!%p256_p3) }
   0xa   : > { %708 = vmatprep.mubr.msk.f32.mxu1 (!%p256_p3), %vm313_vm1, %v388_v7  ;;  %v518_v10 = vld [vmem:[%s918_s6] sm:$0xff] (!%p256_p3) }
   0xb   : > { %v517_v38 = vld [vmem:[%s917_s5] sm:$0xff] (!%p256_p3) }
   0xd   : > { %398 = vperm.xlu0 (!%p256_p3), %759, %v392_v3   ;;  %408 = vperm.xlu1 (!%p256_p3), %760, %v394_v9  }
   0xe   : > { %s925_s24 = smov (!%p291_p4, %s775_s24), 1 }
   0xf   : > { %s679_s30 = sshll.u32 %s925_s24, 3 }
  0x10   : > { %s297_s12 = scalar_lea.vmem %s912_s0, %s679_s30  ;;  %s304_s17 = scalar_lea.vmem %s919_s7, %s679_s30 }
  0x11   : > { %v305_v5 = vld [vmem:[%s297_s12] sm:$0xff]  ;;  %413 = vperm.xlu0 %759, %v395_v6   ;;  %521 = vperm.xlu1 %760, %v518_v10  }
  0x12   : > { %702 = vmatpush3.msra.mxu0 %v305_v5 }
  0x13   : > { %704 = vmatmul.mubr.msk.f32.vlgmr.msra.gmra.mrb[0].mxu0 %vm313_vm1, %v306_v4  ;;  %725 = vmatprep.subr.bf16.mxu0 %v788_v19 }
  0x14   : > { %722 = vmatprep.mubr.msk.f32.mxu0 %vm786_vm0, %v785_v0 }
  0x88   : > { %v311_v11 = vpop.permute.xlu0 %310  ;;  %v404_v21 = vpop.permute.xlu1 %403 }
  0x8c   : > { %v399_v20 = vpop.permute.xlu0 %398  ;;  %v409_v30 = vpop.permute.xlu1 %408 }
  0x90   : > { %v414_v27 = vpop.permute.xlu0 %413  ;;  %v522_v39 = vpop.permute.xlu1 %521 }
  0xe6   : > { %v383_v12 = vpop.f32.mrb[0].mxu0 }
  0xe7   : > { %v384_v13 = vadd.f32 %v383_v12, %v311_v11  ;;  %v705_v14 = vpop.f32.mrb[1].mxu0 }
  0xe9   : > { %v387_v15 = vmax.f32 %v384_v13, 0.0 }
  0xeb   : > { %706 = vmatprep.subr.mxu1 %v387_v15 }
  0xec   : > { %707 = vmatpush3.msra.mxu1 %v387_v15 }
  0xed   : > { %709 = vmatmul.mubr.msk.f32.vlgmr.msra.gmra.mrb[0].mxu1 %vm313_vm1, %v389_v16 }
  0xee   : > { %711 = vmatprep.mubr.msk.f32.mxu1 %vm313_vm1, %v390_v17 }
  0xf1   : > { %712 = vmatmul.mubr.msk.f32.gmra.mrb[2].mxu1 %vm313_vm1, %v391_v18 }
 0x1c0   : > { %v710_v22 = vpop.f32.mrb[0].mxu1 }
 0x1c1   : > { %v500_v23 = vadd.f32 %v710_v22, %v404_v21  ;;  %v494_v24 = vpop.f32.mrb[1].mxu1 }
 0x1c2   : > { %v495_v25 = vadd.f32 %v494_v24, %v399_v20 }
 0x1c3   : > { %v514_v26 = vmax.f32 %v500_v23, 0.0 }
 0x1c4   : > { %v513_v28 = vmax.f32 %v495_v25, 0.0  ;;  %v713_v29 = vpop.f32.mrb[2].mxu1 }
 0x1c5   : > { %v510_v31 = vadd.f32 %v713_v29, %v414_v27  ;;  %v504_v32 = vpop.f32.mrb[3].mxu1 }
 0x1c6   : > { %v726_v33 = vpack.c.bf16 %v514_v26, %v513_v28  ;;  %v505_v34 = vadd.f32 %v504_v32, %v409_v30 }
 0x1c7   : > { %v516_v35 = vmax.f32 %v510_v31, 0.0 }
 0x1c8   : > { %v515_v36 = vmax.f32 %v505_v34, 0.0  ;;  %727 = vmatpush3.bf16.msra.mxu0 %v726_v33 }
 0x1c9   : > { %728 = vmatprep.subr.bf16.mxu0 %v788_v19 }
 0x1ca   : > { %v729_v37 = vpack.c.bf16 %v516_v35, %v515_v36 }
 0x1cc   : > { %730 = vmatpush3.bf16.msra.mxu0 %v729_v37 }
 0x1cf   : > { %723 = vmatmul.mubr.msk.f32.vlgmr.msra.gmra.mrb[2].mxu0 %vm524_vm2, %v517_v38 }
 0x2a2   : > { %v594_v40 = vpop.f32.mrb[2].mxu0 }
 0x2a3   : > { %v595_v41 = vadd.f32 %v594_v40, %v522_v39  ;;  %v724_v42 = vpop.f32.mrb[3].mxu0 }
 0x2a5   : > { %599 = vst.msk [vmem:[%s304_s17] sm:$0xff] %vm598_vm3, %v595_v41 }
 0x2a6 PF: > { %s17_s26 = sadd.s32 1, %s783_s26   ;;  %s920_s24 = smov %s779_s25 }
 0x2a7   : > { %p14_p5 = scmp.ge.s32.totalorder %s17_s26, 4   ;;  %s921_s25 = smov %s923_s27 }
 0x2a9   :  { %16 = sbr.rel (!%p14_p5) target bundleno = 2 (0x2), region = 78 }

</bundles_post_ra>
